<compile_context>
chip_gen: v6e
topology: v6e:2x2x1
jax: 0.10.0
libtpu: 0.0.40
codegen_flags: <defaults>
</compile_context>

<pallas_src>
import functools
import math

import jax
import jax.numpy as jnp
from jax.experimental import pallas as pl
from jax.experimental.pallas import tpu as pltpu

LANE = 128      # vreg lane width
SUBLANE = 8     # vreg sublane count (f32)


def _round_up(x, m):
    return (x + m - 1) // m * m


# ------------------------------ Pallas kernel --------------------------------
def _mlp_kernel(x_ref, w_ref, b_ref, o_ref, *, num_layers):
    """Fused MLP: num_layers x (matmul + bias) with ReLU between layers.

    x_ref: (TN, P)            bf16   activations (rows = flattened batch)
    w_ref: (L, P, P)          bf16   zero-padded stacked weights
    b_ref: (L, 1, P)          f32    zero-padded stacked biases
    o_ref: (TN, P)            f32    padded output
    """
    h = x_ref[...]                                            # bf16 (TN, P)
    for i in range(num_layers):                               # static unroll
        y = jnp.dot(h, w_ref[i], preferred_element_type=jnp.float32)
        y = y + b_ref[i]                                      # f32 bias add
        if i < num_layers - 1:
            h = jnp.maximum(y, 0.0).astype(x_ref.dtype)       # ReLU, back to bf16
        else:
            h = y                                             # last layer: no ReLU
    o_ref[...] = h.astype(o_ref.dtype)


# ------------------------------ host wrapper ----------------------------------
def mlp_forward(x, weights, biases):
    """Apply the MLP to x.

    x:       (..., input_dim) float32
    weights: list of (d_in_i, d_out_i) float32  (note: (in, out) layout)
    biases:  list of (d_out_i,)        float32
    returns: (..., output_dim) float32
    """
    num_layers = len(weights)
    d_in = x.shape[-1]
    d_out = weights[-1].shape[1]
    lead_shape = x.shape[:-1]
    N = int(math.prod(lead_shape)) if lead_shape else 1
    x2 = x.reshape(N, d_in)

    # Lane-dense padded feature width shared by every layer.
    dims = [d_in] + [w.shape[1] for w in weights]
    P = max(_round_up(d, LANE) for d in dims)

    # Pack weights (L, P, P) bf16 and biases (L, 1, P) f32, zero-padded.
    w_stack = jnp.zeros((num_layers, P, P), jnp.float32)
    b_stack = jnp.zeros((num_layers, 1, P), jnp.float32)
    for i, (w, b) in enumerate(zip(weights, biases)):
        w_stack = w_stack.at[i, : w.shape[0], : w.shape[1]].set(w)
        b_stack = b_stack.at[i, 0, : b.shape[0]].set(b)
    w_stack = w_stack.astype(jnp.bfloat16)

    # Row padding / tiling: one block when small (single grid step -> no
    # per-step overhead on single-TC chips); 256-row parallel tiles when big.
    N_pad = _round_up(max(N, SUBLANE), SUBLANE)
    if N_pad <= 256:
        TN = N_pad
    else:
        TN = 256
        N_pad = _round_up(N_pad, TN)
    grid = (N_pad // TN,)

    x_pad = jnp.zeros((N_pad, P), jnp.float32).at[:N, :d_in].set(x2)
    x_pad = x_pad.astype(jnp.bfloat16)

    kernel = functools.partial(_mlp_kernel, num_layers=num_layers)

    flops = 2 * N_pad * P * P * num_layers
    bytes_accessed = (N_pad * P * 2                    # x  (bf16)
                      + num_layers * P * P * 2         # W  (bf16)
                      + num_layers * P * 4             # b  (f32)
                      + N_pad * P * 4)                 # out (f32)

    out_pad = pl.pallas_call(
        kernel,
        out_shape=jax.ShapeDtypeStruct((N_pad, P), jnp.float32),
        grid_spec=pl.GridSpec(
            grid=grid,
            in_specs=[
                pl.BlockSpec((TN, P), lambda r: (r, 0)),
                pl.BlockSpec((num_layers, P, P), lambda r: (0, 0, 0)),
                pl.BlockSpec((num_layers, 1, P), lambda r: (0, 0, 0)),
            ],
            out_specs=pl.BlockSpec((TN, P), lambda r: (r, 0)),
        ),
        compiler_params=pltpu.CompilerParams(
            dimension_semantics=("parallel",)),
        cost_estimate=pl.CostEstimate(
            flops=flops, transcendentals=0, bytes_accessed=bytes_accessed),
    )(x_pad, w_stack, b_stack)

    # Slice padded lanes/rows back BEFORE reshaping (keeps offsets correct).
    return out_pad[:N, :d_out].reshape(*lead_shape, d_out)


# ------------------------------ reference (f32) --------------------------------
def mlp_reference(x, weights, biases):
    h = x
    for i, (w, b) in enumerate(zip(weights, biases)):
        h = h @ w + b
        if i < len(weights) - 1:
            h = jnp.maximum(h, 0.0)
    return h


# ------------------------------ parameter init --------------------------------
def init_mlp_params(key, input_dim, hidden_dim, output_dim, num_layers):
    """PyTorch nn.Linear default init: U(-1/sqrt(fan_in), 1/sqrt(fan_in))."""
    dims_in = [input_dim] + [hidden_dim] * (num_layers - 1)
    dims_out = [hidden_dim] * (num_layers - 1) + [output_dim]
    weights, biases = [], []
    for i, (n, k) in enumerate(zip(dims_in, dims_out)):
        kw, kb = jax.random.split(jax.random.fold_in(key, i))
        bound = 1.0 / math.sqrt(n)
        weights.append(jax.random.uniform(kw, (n, k), jnp.float32, -bound, bound))
        biases.append(jax.random.uniform(kb, (k,), jnp.float32, -bound, bound))
    return weights, biases


# ================================== main ======================================
if __name__ == "__main__":
    key = jax.random.PRNGKey(0)
    k_param, k_x = jax.random.split(key)

    # Small shapes consistent with how the MLP is used in DeformableDETR
    # (e.g. bbox head: MLP(hidden_dim, hidden_dim, 4, 3) over (batch, queries, D)).
    BATCH, QUERIES = 2, 8
    INPUT_DIM, HIDDEN_DIM, OUTPUT_DIM, NUM_LAYERS = 32, 32, 4, 3

    weights, biases = init_mlp_params(k_param, INPUT_DIM, HIDDEN_DIM,
                                      OUTPUT_DIM, NUM_LAYERS)
    x = jax.random.normal(k_x, (BATCH, QUERIES, INPUT_DIM), jnp.float32)

    out = mlp_forward(x, weights, biases)
    out = jax.block_until_ready(out)

    # Correctness against a pure-JAX f32 reference (bf16 MXU operands -> loose tol).
    ref = mlp_reference(x, weights, biases)
    assert out.shape == (BATCH, QUERIES, OUTPUT_DIM), out.shape
    assert jnp.allclose(out, ref, atol=5e-2, rtol=5e-2), (
        float(jnp.max(jnp.abs(out - ref))))

    print("KERNEL_OK")
</pallas_src>

<mosaic_0001>
module attributes {stable_mosaic.version = 11 : i64} {
  func.func @_mlp_kernel(%arg0: i32, %arg1: memref<16x128xbf16, #tpu.memory_space<vmem>>, %arg2: memref<3x128x128xbf16, #tpu.memory_space<vmem>>, %arg3: memref<3x1x128xf32, #tpu.memory_space<vmem>>, %arg4: memref<16x128xf32, #tpu.memory_space<vmem>>) attributes {dimension_semantics = [#tpu.dimension_semantics<parallel>], iteration_bounds = array<i64: 1>, scalar_prefetch = 0 : i64, scratch_operands = 0 : i64, tpu.core_type = #tpu.core_type<tc>, window_params = [{transform_indices = @transform_0, window_bounds = array<i64: 16, 128>}, {pipeline_mode = #tpu.pipeline_mode<synchronous>, transform_indices = @transform_1, window_bounds = array<i64: 3, 128, 128>}, {pipeline_mode = #tpu.pipeline_mode<synchronous>, transform_indices = @transform_2, window_bounds = array<i64: 3, 1, 128>}, {transform_indices = @transform_3, window_bounds = array<i64: 16, 128>}]} {
    %c0 = arith.constant 0 : index
    %c0_0 = arith.constant 0 : index
    %0 = vector.load %arg1[%c0, %c0_0] : memref<16x128xbf16, #tpu.memory_space<vmem>>, vector<16x128xbf16>
    %c0_1 = arith.constant 0 : index
    %c0_2 = arith.constant 0 : index
    %c0_3 = arith.constant 0 : index
    %1 = vector.load %arg2[%c0_1, %c0_2, %c0_3] : memref<3x128x128xbf16, #tpu.memory_space<vmem>>, vector<1x128x128xbf16>
    %2 = vector.shape_cast %1 : vector<1x128x128xbf16> to vector<128x128xbf16>
    %cst = arith.constant dense<0.000000e+00> : vector<16x128xf32>
    %3 = tpu.matmul %0, %2, %cst {dimension_numbers = #tpu.dot_dimension_numbers<[1], [0], [0], [1], [0, 0, 1, 1], [], []>} : vector<16x128xbf16>, vector<128x128xbf16>, vector<16x128xf32> -> vector<16x128xf32>
    %c0_4 = arith.constant 0 : index
    %c0_5 = arith.constant 0 : index
    %c0_6 = arith.constant 0 : index
    %4 = vector.load %arg3[%c0_4, %c0_5, %c0_6] : memref<3x1x128xf32, #tpu.memory_space<vmem>>, vector<1x1x128xf32>
    %5 = vector.shape_cast %4 : vector<1x1x128xf32> to vector<1x128xf32>
    %6 = vector.broadcast %5 : vector<1x128xf32> to vector<16x128xf32>
    %7 = arith.addf %3, %6 : vector<16x128xf32>
    %cst_7 = arith.constant 0.000000e+00 : f32
    %8 = vector.broadcast %cst_7 : f32 to vector<16x128xf32>
    %9 = arith.maximumf %7, %8 : vector<16x128xf32>
    %10 = arith.truncf %9 : vector<16x128xf32> to vector<16x128xbf16>
    %c1 = arith.constant 1 : index
    %c0_8 = arith.constant 0 : index
    %c0_9 = arith.constant 0 : index
    %11 = vector.load %arg2[%c1, %c0_8, %c0_9] : memref<3x128x128xbf16, #tpu.memory_space<vmem>>, vector<1x128x128xbf16>
    %12 = vector.shape_cast %11 : vector<1x128x128xbf16> to vector<128x128xbf16>
    %cst_10 = arith.constant dense<0.000000e+00> : vector<16x128xf32>
    %13 = tpu.matmul %10, %12, %cst_10 {dimension_numbers = #tpu.dot_dimension_numbers<[1], [0], [0], [1], [0, 0, 1, 1], [], []>} : vector<16x128xbf16>, vector<128x128xbf16>, vector<16x128xf32> -> vector<16x128xf32>
    %c1_11 = arith.constant 1 : index
    %c0_12 = arith.constant 0 : index
    %c0_13 = arith.constant 0 : index
    %14 = vector.load %arg3[%c1_11, %c0_12, %c0_13] : memref<3x1x128xf32, #tpu.memory_space<vmem>>, vector<1x1x128xf32>
    %15 = vector.shape_cast %14 : vector<1x1x128xf32> to vector<1x128xf32>
    %16 = vector.broadcast %15 : vector<1x128xf32> to vector<16x128xf32>
    %17 = arith.addf %13, %16 : vector<16x128xf32>
    %cst_14 = arith.constant 0.000000e+00 : f32
    %18 = vector.broadcast %cst_14 : f32 to vector<16x128xf32>
    %19 = arith.maximumf %17, %18 : vector<16x128xf32>
    %20 = arith.truncf %19 : vector<16x128xf32> to vector<16x128xbf16>
    %c2 = arith.constant 2 : index
    %c0_15 = arith.constant 0 : index
    %c0_16 = arith.constant 0 : index
    %21 = vector.load %arg2[%c2, %c0_15, %c0_16] : memref<3x128x128xbf16, #tpu.memory_space<vmem>>, vector<1x128x128xbf16>
    %22 = vector.shape_cast %21 : vector<1x128x128xbf16> to vector<128x128xbf16>
    %cst_17 = arith.constant dense<0.000000e+00> : vector<16x128xf32>
    %23 = tpu.matmul %20, %22, %cst_17 {dimension_numbers = #tpu.dot_dimension_numbers<[1], [0], [0], [1], [0, 0, 1, 1], [], []>} : vector<16x128xbf16>, vector<128x128xbf16>, vector<16x128xf32> -> vector<16x128xf32>
    %c2_18 = arith.constant 2 : index
    %c0_19 = arith.constant 0 : index
    %c0_20 = arith.constant 0 : index
    %24 = vector.load %arg3[%c2_18, %c0_19, %c0_20] : memref<3x1x128xf32, #tpu.memory_space<vmem>>, vector<1x1x128xf32>
    %25 = vector.shape_cast %24 : vector<1x1x128xf32> to vector<1x128xf32>
    %26 = vector.broadcast %25 : vector<1x128xf32> to vector<16x128xf32>
    %27 = arith.addf %23, %26 : vector<16x128xf32>
    %c0_21 = arith.constant 0 : index
    %c0_22 = arith.constant 0 : index
    %28 = vector.load %arg4[%c0_21, %c0_22] : memref<16x128xf32, #tpu.memory_space<vmem>>, vector<16x128xf32>
    tpu.vector_store %arg4[%c0_21, %c0_22], %27 {strides = array<i32>} : memref<16x128xf32, #tpu.memory_space<vmem>>, vector<16x128xf32>,
    return
  }
  func.func @transform_0(%arg0: i32) -> (i32, i32) {
    %c0_i32 = arith.constant 0 : i32
    %c0_i32_0 = arith.constant 0 : i32
    return %arg0, %c0_i32 : i32, i32
  }
  func.func @transform_1(%arg0: i32) -> (i32, i32, i32) {
    %c0_i32 = arith.constant 0 : i32
    %c0_i32_0 = arith.constant 0 : i32
    %c0_i32_1 = arith.constant 0 : i32
    %c0_i32_2 = arith.constant 0 : i32
    return %c0_i32, %c0_i32_0, %c0_i32_1 : i32, i32, i32
  }
  func.func @transform_2(%arg0: i32) -> (i32, i32, i32) {
    %c0_i32 = arith.constant 0 : i32
    %c0_i32_0 = arith.constant 0 : i32
    %c0_i32_1 = arith.constant 0 : i32
    %c0_i32_2 = arith.constant 0 : i32
    return %c0_i32, %c0_i32_0, %c0_i32_1 : i32, i32, i32
  }
  func.func @transform_3(%arg0: i32) -> (i32, i32) {
    %c0_i32 = arith.constant 0 : i32
    %c0_i32_0 = arith.constant 0 : i32
    return %arg0, %c0_i32 : i32, i32
  }
}

</mosaic_0001>

<bundles_post_ra>
// kernel: tpu_custom_call.1
= control target key start
LH: loop header
LB: loop body
LE: loop exit
PB: predicated region body
PF: predicated region fallthrough
CT: control target
= control target key end

     0   :  { %8 = vsyncpa [#allocation3], 0  ;;  %s712_s0 = inlined_call_operand.hbm [shape: bf16[16,128], index: 0, kind: input, shape index: {}]   ;;  %s713_s1 = inlined_call_operand.hbm [shape: bf16[3,128,128], index: 1, kind: input, shape index: {}]   ;;  %s714_s2 = inlined_call_operand.vmem [shape: f32[3,1,128], index: 2, kind: input, shape index: {}]   ;;  %s715_s3 = inlined_call_operand.hbm [shape: f32[16,128], index: 3, kind: output, shape index: {}]  }
   0x1   :  { %9 = vsyncpa [#allocation6], 0 }
   0x2   :  { %10 = vsyncpa [#allocation4], 0  ;;  %s635_s12 = smov [#allocation2]  }
   0x3   :  { %s16_s13 = sshll.u32 %s635_s12, 4  ;;  %s17_s13 = int_to_ptr.vmem [resolvable:$true] %s16_s13 }
   0x4   :  { %s577_s14 = scalar_lea.vmem %s17_s13, 128  ;;  %p582_p1 = scmp.lt.s32.totalorder %s17_s13, %s17_s13 }
   0x5   :  { %p578_p0 = scmp.ne.s32.totalorder %s17_s13, %s577_s14  ;;  %p583_p2 = scmp.lt.s32.totalorder %s577_s14, %s577_s14 }
   0x7   :  { %p584_p3 = por %p583_p2, %p582_p1 }
   0x9   :  { %p585_p4 = pnand %p584_p3, %p578_p0 }
   0xb   :  { %588 = shalt.err (!%p585_p4)
}
   0xc   :  { %s636_s15 = smov 64   ;;  %s637_s16 = smov 4  }
   0xd   :  { %22 = dma.hbm_to_vmem [thread:$0]  %s712_s0, 128, %s17_s13, [#allocation3], %s636_s15, %s636_s15, %s637_s16  }
   0xe   :  { %s638_s19 = smov [#allocation5]  }
   0xf   :  { %s28_s20 = sshll.u32 %s638_s19, 4  ;;  %s29_s20 = int_to_ptr.vmem [resolvable:$true] %s28_s20 }
  0x10   :  { %s597_s21 = scalar_lea.vmem %s29_s20, 3072  ;;  %p602_p6 = scmp.lt.s32.totalorder %s29_s20, %s29_s20 }
  0x11   :  { %p598_p5 = scmp.ne.s32.totalorder %s29_s20, %s597_s21  ;;  %p603_p7 = scmp.lt.s32.totalorder %s597_s21, %s597_s21 }
  0x13   :  { %p604_p8 = por %p603_p7, %p602_p6 }
  0x15   :  { %p605_p9 = pnand %p604_p8, %p598_p5 }
  0x17   :  { %608 = shalt.err (!%p605_p9)
}
  0x18   :  { %34 = dma.hbm_to_vmem [thread:$0]  %s713_s1, 3072, %s29_s20, [#allocation6], %s636_s15, %s636_s15, %s637_s16  }
  0x19   :  { %629 = dma.done.wait [#allocation3], 128  }
  0x1a   :  { %630 = vsyncadd [#allocation3], 4294967168 }
  0x1b   :  { %631 = dma.done.wait [#allocation6], 3072  }
  0x1c   :  { %632 = vsyncadd [#allocation6], 4294964224  ;;  %v639_v0 = vmov 0.0   ;;  %vm640_vm0 = vmmov 0   ;;  %v544_v1 = vld [vmem:[#allocation5 + $0x38] sm:$0xff]   ;;  %v545_v2 = vld [vmem:[#allocation5 + $0x30] sm:$0xff]  }
  0x1d   :  { %475 = vmatprep.subr.bf16.mxu0 %v639_v0  ;;  %491 = vmatprep.mubr.msk.bf16.mxu0 %vm640_vm0, %v639_v0  ;;  %v546_v3 = vld [vmem:[#allocation5 + $0x28] sm:$0xff]   ;;  %v553_v4 = vld [vmem:[#allocation5 + $0x78] sm:$0xff]   ;;  %v547_v5 = vld [vmem:[#allocation5 + $0x20] sm:$0xff]   ;;  %s641_s28 = smov [#allocation7]  }
  0x1e   :  { %495 = vmatprep.subr.bf16.mxu1 %v639_v0  ;;  %511 = vmatprep.mubr.msk.bf16.mxu1 %vm640_vm0, %v639_v0  ;;  %v554_v6 = vld [vmem:[#allocation5 + $0x70] sm:$0xff]   ;;  %v548_v7 = vld [vmem:[#allocation5 + $0x18] sm:$0xff]   ;;  %v555_v8 = vld [vmem:[#allocation5 + $0x68] sm:$0xff]   ;;  %s405_s29 = sshll.u32 %s641_s28, 4  ;;  %s406_s29 = int_to_ptr.vmem [resolvable:$true] %s405_s29 }
  0x1f   :  { %476 = vmatpush3.bf16.msra.mxu0 %v544_v1  ;;  %496 = vmatpush3.bf16.msra.mxu1 %v553_v4  ;;  %v549_v9 = vld [vmem:[#allocation5 + $0x10] sm:$0xff]   ;;  %v556_v10 = vld [vmem:[#allocation5 + $0x60] sm:$0xff]   ;;  %v550_v11 = vld [vmem:[#allocation5 + $0x8] sm:$0xff]   ;;  %s609_s30 = scalar_lea.vmem %s406_s29, 256  ;;  %p614_p11 = scmp.lt.s32.totalorder %s406_s29, %s406_s29 }
  0x20   :  { %477 = vmatprep.subr.bf16.mxu0 %v639_v0  ;;  %497 = vmatprep.subr.bf16.mxu1 %v639_v0  ;;  %v557_v12 = vld [vmem:[#allocation5 + $0x58] sm:$0xff]   ;;  %v551_v13 = vld [vmem:[#allocation5] sm:$0xff]   ;;  %v558_v15 = vld [vmem:[#allocation5 + $0x50] sm:$0xff]   ;;  %p610_p10 = scmp.ne.s32.totalorder %s406_s29, %s609_s30  ;;  %p615_p12 = scmp.lt.s32.totalorder %s609_s30, %s609_s30 }
  0x21   :  { %v552_v14 = vld [vmem:[#allocation2] sm:$0xff]   ;;  %v559_v16 = vld [vmem:[#allocation5 + $0x48] sm:$0xff]   ;;  %v560_v17 = vld [vmem:[#allocation5 + $0x40] sm:$0xff]  }
  0x22   :  { %v561_v18 = vld [vmem:[#allocation5 + $0xb8] sm:$0xff]   ;;  %v562_v19 = vld [vmem:[#allocation5 + $0xb0] sm:$0xff]   ;;  %v563_v20 = vld [vmem:[#allocation5 + $0xa8] sm:$0xff]   ;;  %p616_p13 = por %p615_p12, %p614_p11 }
  0x23   :  { %478 = vmatpush3.bf16.msra.mxu0 %v545_v2  ;;  %498 = vmatpush3.bf16.msra.mxu1 %v554_v6  ;;  %v564_v21 = vld [vmem:[#allocation5 + $0xa0] sm:$0xff]   ;;  %v565_v22 = vld [vmem:[#allocation5 + $0x98] sm:$0xff]   ;;  %v566_v33 = vld [vmem:[#allocation5 + $0x90] sm:$0xff]  }
  0x24   :  { %479 = vmatprep.subr.bf16.mxu0 %v639_v0  ;;  %499 = vmatprep.subr.bf16.mxu1 %v639_v0  ;;  %v418_v23 = vld [vmem:[%s714_s2] ss:$0 sm:$0xff]  ;;  %v567_v34 = vld [vmem:[#allocation5 + $0x88] sm:$0xff]   ;;  %v568_v35 = vld [vmem:[#allocation5 + $0x80] sm:$0xff]   ;;  %p617_p0 = pnand %p616_p13, %p610_p10 }
  0x25   :  { %v429_v36 = vld [vmem:[%s714_s2 + $0x1] ss:$0 sm:$0xff]  ;;  %v439_v46 = vld [vmem:[%s714_s2 + $0x2] ss:$0 sm:$0xff] }
  0x27   :  { %480 = vmatpush3.bf16.msra.mxu0 %v546_v3  ;;  %500 = vmatpush3.bf16.msra.mxu1 %v555_v8 }
  0x28   :  { %481 = vmatprep.subr.bf16.mxu0 %v639_v0  ;;  %501 = vmatprep.subr.bf16.mxu1 %v639_v0 }
  0x2b   :  { %482 = vmatpush3.bf16.msra.mxu0 %v547_v5  ;;  %502 = vmatpush3.bf16.msra.mxu1 %v556_v10 }
  0x2c   :  { %483 = vmatprep.subr.bf16.mxu0 %v639_v0  ;;  %503 = vmatprep.subr.bf16.mxu1 %v639_v0 }
  0x2f   :  { %484 = vmatpush3.bf16.msra.mxu0 %v548_v7  ;;  %504 = vmatpush3.bf16.msra.mxu1 %v557_v12 }
  0x30   :  { %485 = vmatprep.subr.bf16.mxu0 %v639_v0  ;;  %505 = vmatprep.subr.bf16.mxu1 %v639_v0 }
  0x33   :  { %486 = vmatpush3.bf16.msra.mxu0 %v549_v9  ;;  %506 = vmatpush3.bf16.msra.mxu1 %v558_v15 }
  0x34   :  { %487 = vmatprep.subr.bf16.mxu0 %v639_v0  ;;  %507 = vmatprep.subr.bf16.mxu1 %v639_v0 }
  0x37   :  { %488 = vmatpush3.bf16.msra.mxu0 %v550_v11  ;;  %508 = vmatpush3.bf16.msra.mxu1 %v559_v16 }
  0x38   :  { %489 = vmatprep.subr.bf16.mxu0 %v639_v0  ;;  %509 = vmatprep.subr.bf16.mxu1 %v639_v0 }
  0x3b   :  { %490 = vmatpush3.bf16.msra.mxu0 %v551_v13  ;;  %510 = vmatpush3.bf16.msra.mxu1 %v560_v17 }
  0x3c   :  { %515 = vmatprep.subr.bf16.mxu0 %v639_v0 }
  0x3e   :  { %492 = vmatmul.mubr.bf16.vlgmr.msra.gmra.mxu0 %v552_v14 }
  0x3f   :  { %531 = vmatprep.mubr.msk.bf16.mxu0 %vm640_vm0, %v639_v0  ;;  %516 = vmatpush3.bf16.msra.mxu0 %v561_v18 }
  0x40   :  { %517 = vmatprep.subr.bf16.mxu0 %v639_v0 }
  0x43   :  { %518 = vmatpush3.bf16.msra.mxu0 %v562_v19 }
  0x44   :  { %519 = vmatprep.subr.bf16.mxu0 %v639_v0 }
  0x47   :  { %520 = vmatpush3.bf16.msra.mxu0 %v563_v20 }
  0x48   :  { %521 = vmatprep.subr.bf16.mxu0 %v639_v0 }
  0x4b   :  { %522 = vmatpush3.bf16.msra.mxu0 %v564_v21 }
  0x4c   :  { %523 = vmatprep.subr.bf16.mxu0 %v639_v0 }
  0x4f   :  { %524 = vmatpush3.bf16.msra.mxu0 %v565_v22 }
  0x50   :  { %525 = vmatprep.subr.bf16.mxu0 %v639_v0 }
  0x53   :  { %526 = vmatpush3.bf16.msra.mxu0 %v566_v33 }
  0x54   :  { %527 = vmatprep.subr.bf16.mxu0 %v639_v0 }
  0x57   :  { %528 = vmatpush3.bf16.msra.mxu0 %v567_v34 }
  0x58   :  { %529 = vmatprep.subr.bf16.mxu0 %v639_v0 }
  0x5b   :  { %530 = vmatpush3.bf16.msra.mxu0 %v568_v35 }
  0xfe   :  { %v157_v24 = vpop.f32.mrf.mxu0 }
  0xff   :  { %v158_v26 = vadd.f32 %v418_v23, %v157_v24 }
 0x100   :  { %v493_v25 = vpop.f32.mrf.mxu0 }
 0x101   :  { %v164_v30 = vmax.f32 %v158_v26, 0.0 }
 0x102   :  { %v160_v27 = vpop.f32.mrf.mxu0 }
 0x103   :  { %v161_v28 = vadd.f32 %v418_v23, %v160_v27 }
 0x104   :  { %v494_v29 = vpop.f32.mrf.mxu0 }
 0x105   :  { %v165_v31 = vmax.f32 %v161_v28, 0.0 }
 0x107   :  { %v166_v32 = vpack.c.bf16 %v165_v31, %v164_v30 }
 0x109   :  { %512 = vmatmul.mubr.bf16.vlgmr.msra.gmra.mxu1 %v166_v32 }
 0x1c9   :  { %v274_v37 = vpop.f32.mrf.mxu1 }
 0x1ca   :  { %v275_v39 = vadd.f32 %v429_v36, %v274_v37 }
 0x1cb   :  { %v513_v38 = vpop.f32.mrf.mxu1 }
 0x1cc   :  { %v281_v43 = vmax.f32 %v275_v39, 0.0 }
 0x1cd   :  { %v277_v40 = vpop.f32.mrf.mxu1 }
 0x1ce   :  { %v278_v41 = vadd.f32 %v429_v36, %v277_v40 }
 0x1cf   :  { %v514_v42 = vpop.f32.mrf.mxu1 }
 0x1d0   :  { %v282_v44 = vmax.f32 %v278_v41, 0.0 }
 0x1d2   :  { %v283_v45 = vpack.c.bf16 %v282_v44, %v281_v43 }
 0x1d4   :  { %532 = vmatmul.mubr.bf16.vlgmr.msra.gmra.mxu0 %v283_v45 }
 0x294   :  { %v391_v47 = vpop.f32.mrf.mxu0 }
 0x295   :  { %v392_v48 = vadd.f32 %v439_v46, %v391_v47 }
 0x296   :  { %v533_v49 = vpop.f32.mrf.mxu0 }
 0x297   :  { %398 = vst [vmem:[#allocation7] sm:$0xff] %v392_v48 }
 0x298   :  { %v394_v50 = vpop.f32.mrf.mxu0 }
 0x299   :  { %v395_v51 = vadd.f32 %v439_v46, %v394_v50 }
 0x29a   :  { %v534_v52 = vpop.f32.mrf.mxu0 }
 0x29b   :  { %399 = vst [vmem:[#allocation7 + $0x8] sm:$0xff] %v395_v51 }
 0x29c   :  { %620 = shalt.err (!%p617_p0)
}
 0x29d   :  { %s642_s4 = smov 128   ;;  %s643_s2 = smov 8  }
 0x29e   :  { %411 = dma.vmem_to_hbm [thread:$0]  %s406_s29, 256, %s715_s3, [#allocation4], %s642_s4, %s642_s4, %s643_s2  }
 0x29f   :  { %633 = dma.done.wait [#allocation4], 256  }
 0x2a0   :  { %634 = vsyncadd [#allocation4], 4294967040 }
 0x2a1   :  { %415 = vsyncpa [#allocation3], 1 }
 0x2a2   :  { %416 = vsyncpa [#allocation6], 1 }
 0x2a3   :  { %417 = vsyncpa [#allocation4], 1 }

</bundles_post_ra>
